<compile_context>
chip_gen: v5e
topology: v5e:2x2
jax: 0.10.0
libtpu: 0.0.40
codegen_flags: <defaults>
</compile_context>

<pallas_src>
import functools

import jax
import jax.numpy as jnp
from jax.experimental import pallas as pl
from jax.experimental.pallas import tpu as pltpu


def _round_up(v, m):
    return (v + m - 1) // m * m


def _mlp_kernel(n_hidden, compute_dtype, *refs):
    """refs = (x_ref, w0, b0, w1, b1, ..., w_out, b_out, logits_ref, preds_ref).

    Weights are bf16 (or `compute_dtype`), biases f32.  All matmuls accumulate
    in f32 on the MXU; bias add / ReLU / softmax are f32 on the VPU/EUP.
    """
    x_ref = refs[0]
    logits_ref = refs[-2]
    preds_ref = refs[-1]
    param_refs = refs[1:-2]  # alternating (w, b): n_hidden hidden layers + 1 output

    h = x_ref[...]  # f32 (TB, F)

    # hidden[0]
    w0 = param_refs[0][...]
    b0 = param_refs[1][...]
    h = jnp.dot(h.astype(compute_dtype), w0,
                preferred_element_type=jnp.float32) + b0

    # hidden[1:] -- ReLU then Linear
    for i in range(1, n_hidden):
        w = param_refs[2 * i][...]
        b = param_refs[2 * i + 1][...]
        h = jnp.maximum(h, 0.0)
        h = jnp.dot(h.astype(compute_dtype), w,
                    preferred_element_type=jnp.float32) + b

    # output layer (NO ReLU before it, matching the PyTorch forward).
    # Padded class lanes carry a -1e30 bias -> exp underflows to exactly 0.
    w_out = param_refs[2 * n_hidden][...]
    b_out = param_refs[2 * n_hidden + 1][...]
    logits = jnp.dot(h.astype(compute_dtype), w_out,
                     preferred_element_type=jnp.float32) + b_out

    # emb / raw_out output (dense 128-lane store; pad lanes sliced off outside)
    logits_ref[...] = logits.astype(logits_ref.dtype)

    # softmax over dim=1 (class axis), numerically stable
    m = jnp.max(logits, axis=1, keepdims=True)
    e = jnp.exp(logits - m)
    denom = jnp.sum(e, axis=1, keepdims=True)
    preds_ref[...] = (e * pl.reciprocal(denom, approx=True)).astype(preds_ref.dtype)


def proposed1_net_forward(x, hidden_params, output_params, *,
                          compute_dtype=jnp.bfloat16,
                          max_block_batch=512,
                          lane_pad=128):
    """x: (B, F) float32.  hidden_params: list of (W_in_out, b); output_params: (W, b).

    Returns (logits, preds), both (B, C) float32.
    """
    n_hidden = len(hidden_params)
    B, F = x.shape
    H = hidden_params[0][0].shape[1]
    C = output_params[0].shape[1]
    C_pad = _round_up(C, lane_pad)

    # ---- batch tiling: biggest tile that helps, multiple of 8 sublanes ----
    TB = min(max_block_batch, _round_up(B, 8))
    B_pad = _round_up(B, TB)
    if B_pad != B:
        x = jnp.pad(x, ((0, B_pad - B), (0, 0)))

    # ---- parameter prep: bf16 weights, f32 biases, lane-padded output head ----
    flat_params = []
    for idx, (w, b) in enumerate(hidden_params + [output_params]):
        if idx == n_hidden and C_pad != C:  # output layer: pad class dim
            w = jnp.pad(w, ((0, 0), (0, C_pad - C)))
            b = jnp.pad(b, (0, C_pad - C), constant_values=-1e30)
        flat_params.append(w.astype(compute_dtype))
        flat_params.append(b.reshape(1, -1).astype(jnp.float32))

    grid = (B_pad // TB,)
    in_specs = [pl.BlockSpec((TB, F), lambda i: (i, 0))]
    for p in flat_params:
        # Constant index_map -> weights/biases DMA'd once, stay VMEM-resident.
        in_specs.append(pl.BlockSpec(p.shape, lambda i: (0, 0)))
    out_specs = (pl.BlockSpec((TB, C_pad), lambda i: (i, 0)),
                 pl.BlockSpec((TB, C_pad), lambda i: (i, 0)))
    out_shape = (jax.ShapeDtypeStruct((B_pad, C_pad), jnp.float32),
                 jax.ShapeDtypeStruct((B_pad, C_pad), jnp.float32))

    # ---- cost estimate for XLA scheduling ----
    flops = 2 * B_pad * (F * H + (n_hidden - 1) * H * H + H * C_pad)
    transcendentals = B_pad * C_pad  # exp in softmax
    bytes_accessed = int(
        x.size * x.dtype.itemsize
        + sum(int(p.size) * p.dtype.itemsize for p in flat_params)
        + 2 * B_pad * C_pad * 4
    )

    # ---- VMEM budget (v7x has 64 MiB physical; leave headroom) ----
    param_bytes = sum(int(p.size) * p.dtype.itemsize for p in flat_params)
    stream_bytes = 2 * (TB * F * 4 + 2 * TB * C_pad * 4)    # double-buffered x / 2 out tiles
    act_bytes = 4 * TB * max(F, H, C_pad) * 4               # live f32 activations headroom
    vmem_limit = int(min(64 * 1024 * 1024,
                         max(32 * 1024 * 1024,
                             2 * (param_bytes + stream_bytes + act_bytes))))

    kernel = functools.partial(_mlp_kernel, n_hidden, compute_dtype)

    logits_pad, preds_pad = pl.pallas_call(
        kernel,
        out_shape=out_shape,
        grid=grid,
        in_specs=in_specs,
        out_specs=out_specs,
        compiler_params=pltpu.CompilerParams(
            dimension_semantics=("parallel",),   # shards batch tiles across TCs on v7x
            vmem_limit_bytes=vmem_limit,
        ),
        cost_estimate=pl.CostEstimate(
            flops=flops,
            transcendentals=transcendentals,
            bytes_accessed=bytes_accessed,
        ),
    )(x, *flat_params)

    return logits_pad[:B, :C], preds_pad[:B, :C]


# ----------------------------- init / reference -----------------------------

def _kaiming_uniform(key, fan_in, shape):
    # nn.init.kaiming_uniform_ default (a=0): bound = sqrt(6 / fan_in)
    bound = jnp.sqrt(6.0 / fan_in)
    return jax.random.uniform(key, shape, jnp.float32, -bound, bound)


def _bias_init(key, fan_in, shape):
    # default nn.Linear bias init: U(-1/sqrt(fan_in), 1/sqrt(fan_in))
    bound = 1.0 / jnp.sqrt(fan_in)
    return jax.random.uniform(key, shape, jnp.float32, -bound, bound)


def init_params(key, n_feats, layer_size, n_layer, n_class):
    """Deterministically build all parameters (weights stored as (in, out))."""
    keys = jax.random.split(key, 2 * (n_layer + 2))
    ki = iter(keys)

    hidden_params = []
    # hidden[0]: (n_feats -> layer_size)
    w = _kaiming_uniform(next(ki), n_feats, (n_feats, layer_size))
    b = _bias_init(next(ki), n_feats, (layer_size,))
    hidden_params.append((w, b))
    # hidden[1:]: (layer_size -> layer_size)
    for _ in range(n_layer - 1):
        w = _kaiming_uniform(next(ki), layer_size, (layer_size, layer_size))
        b = _bias_init(next(ki), layer_size, (layer_size,))
        hidden_params.append((w, b))

    # output: (layer_size -> n_class)
    w_out = _kaiming_uniform(next(ki), layer_size, (layer_size, n_class))
    b_out = _bias_init(next(ki), layer_size, (n_class,))

    # beta head: (layer_size + 1 -> 2); only used by the loss's extra_args path.
    w_beta = _kaiming_uniform(next(ki), layer_size + 1, (layer_size + 1, 2))
    b_beta = _bias_init(next(ki), layer_size + 1, (2,))

    return hidden_params, (w_out, b_out), (w_beta, b_beta)


def reference_forward(x, hidden_params, output_params, compute_dtype=jnp.float32):
    """Pure-JAX reference; compute_dtype lets us match the kernel's bf16 matmuls."""
    h = x.astype(jnp.float32)
    w0, b0 = hidden_params[0]
    h = jnp.dot(h.astype(compute_dtype), w0.astype(compute_dtype),
                preferred_element_type=jnp.float32) + b0
    for (w, b) in hidden_params[1:]:
        h = jnp.maximum(h, 0.0)
        h = jnp.dot(h.astype(compute_dtype), w.astype(compute_dtype),
                    preferred_element_type=jnp.float32) + b
    w_out, b_out = output_params
    logits = jnp.dot(h.astype(compute_dtype), w_out.astype(compute_dtype),
                     preferred_element_type=jnp.float32) + b_out
    return logits, jax.nn.softmax(logits, axis=1)


if __name__ == "__main__":
    # Small, module-consistent shapes:
    #   data_params  = {'n_feats': 32, 'n_class': 4}
    #   hyperparams  = {'n_layer': 3, 'layer_s': 32}
    B, F, H, L, C = 8, 32, 32, 3, 4

    key = jax.random.PRNGKey(0)
    k_x, k_p = jax.random.split(key)
    x = jax.random.normal(k_x, (B, F), jnp.float32)

    hidden_params, output_params, beta_params = init_params(k_p, F, H, L, C)

    logits, preds = proposed1_net_forward(x, hidden_params, output_params)
    logits = jax.block_until_ready(logits)
    preds = jax.block_until_ready(preds)

    # Reference with matching bf16 matmul precision, and a full-f32 sanity ref.
    ref_logits_bf16, ref_preds_bf16 = reference_forward(
        x, hidden_params, output_params, compute_dtype=jnp.bfloat16)
    ref_logits_f32, ref_preds_f32 = reference_forward(
        x, hidden_params, output_params, compute_dtype=jnp.float32)

    assert logits.shape == (B, C) and preds.shape == (B, C)
    assert bool(jnp.all(jnp.isfinite(logits)))
    assert bool(jnp.all(jnp.isfinite(preds)))
    assert jnp.allclose(logits, ref_logits_bf16, atol=2e-2, rtol=2e-2)
    assert jnp.allclose(preds, ref_preds_bf16, atol=1e-2, rtol=1e-2)
    assert jnp.allclose(logits, ref_logits_f32, atol=5e-2, rtol=5e-2)
    assert jnp.allclose(preds, ref_preds_f32, atol=5e-2, rtol=5e-2)
    assert jnp.allclose(jnp.sum(preds, axis=1), 1.0, atol=1e-2)

    print("KERNEL_OK")
</pallas_src>

<mosaic_0001>
module attributes {stable_mosaic.version = 11 : i64} {
  func.func @_mlp_kernel(%arg0: i32, %arg1: memref<8x32xf32, #tpu.memory_space<vmem>>, %arg2: memref<32x32xbf16, #tpu.memory_space<vmem>>, %arg3: memref<1x32xf32, #tpu.memory_space<vmem>>, %arg4: memref<32x32xbf16, #tpu.memory_space<vmem>>, %arg5: memref<1x32xf32, #tpu.memory_space<vmem>>, %arg6: memref<32x32xbf16, #tpu.memory_space<vmem>>, %arg7: memref<1x32xf32, #tpu.memory_space<vmem>>, %arg8: memref<32x128xbf16, #tpu.memory_space<vmem>>, %arg9: memref<1x128xf32, #tpu.memory_space<vmem>>, %arg10: memref<8x128xf32, #tpu.memory_space<vmem>>, %arg11: memref<8x128xf32, #tpu.memory_space<vmem>>) attributes {dimension_semantics = [#tpu.dimension_semantics<parallel>], iteration_bounds = array<i64: 1>, scalar_prefetch = 0 : i64, scratch_operands = 0 : i64, tpu.core_type = #tpu.core_type<tc>, window_params = [{transform_indices = @transform_0, window_bounds = array<i64: 8, 32>}, {pipeline_mode = #tpu.pipeline_mode<synchronous>, transform_indices = @transform_1, window_bounds = array<i64: 32, 32>}, {pipeline_mode = #tpu.pipeline_mode<synchronous>, transform_indices = @transform_2, window_bounds = array<i64: 1, 32>}, {pipeline_mode = #tpu.pipeline_mode<synchronous>, transform_indices = @transform_3, window_bounds = array<i64: 32, 32>}, {pipeline_mode = #tpu.pipeline_mode<synchronous>, transform_indices = @transform_4, window_bounds = array<i64: 1, 32>}, {pipeline_mode = #tpu.pipeline_mode<synchronous>, transform_indices = @transform_5, window_bounds = array<i64: 32, 32>}, {pipeline_mode = #tpu.pipeline_mode<synchronous>, transform_indices = @transform_6, window_bounds = array<i64: 1, 32>}, {pipeline_mode = #tpu.pipeline_mode<synchronous>, transform_indices = @transform_7, window_bounds = array<i64: 32, 128>}, {pipeline_mode = #tpu.pipeline_mode<synchronous>, transform_indices = @transform_8, window_bounds = array<i64: 1, 128>}, {transform_indices = @transform_9, window_bounds = array<i64: 8, 128>}, {transform_indices = @transform_10, window_bounds = array<i64: 8, 128>}]} {
    %c0 = arith.constant 0 : index
    %c0_0 = arith.constant 0 : index
    %0 = vector.load %arg1[%c0, %c0_0] : memref<8x32xf32, #tpu.memory_space<vmem>>, vector<8x32xf32>
    %c0_1 = arith.constant 0 : index
    %c0_2 = arith.constant 0 : index
    %1 = vector.load %arg2[%c0_1, %c0_2] : memref<32x32xbf16, #tpu.memory_space<vmem>>, vector<32x32xbf16>
    %c0_3 = arith.constant 0 : index
    %c0_4 = arith.constant 0 : index
    %2 = vector.load %arg3[%c0_3, %c0_4] : memref<1x32xf32, #tpu.memory_space<vmem>>, vector<1x32xf32>
    %3 = arith.truncf %0 : vector<8x32xf32> to vector<8x32xbf16>
    %cst = arith.constant dense<0.000000e+00> : vector<8x32xf32>
    %4 = tpu.matmul %3, %1, %cst {dimension_numbers = #tpu.dot_dimension_numbers<[1], [0], [0], [1], [0, 0, 1, 1], [], []>} : vector<8x32xbf16>, vector<32x32xbf16>, vector<8x32xf32> -> vector<8x32xf32>
    %5 = vector.broadcast %2 : vector<1x32xf32> to vector<8x32xf32>
    %6 = arith.addf %4, %5 : vector<8x32xf32>
    %c0_5 = arith.constant 0 : index
    %c0_6 = arith.constant 0 : index
    %7 = vector.load %arg4[%c0_5, %c0_6] : memref<32x32xbf16, #tpu.memory_space<vmem>>, vector<32x32xbf16>
    %c0_7 = arith.constant 0 : index
    %c0_8 = arith.constant 0 : index
    %8 = vector.load %arg5[%c0_7, %c0_8] : memref<1x32xf32, #tpu.memory_space<vmem>>, vector<1x32xf32>
    %cst_9 = arith.constant 0.000000e+00 : f32
    %9 = vector.broadcast %cst_9 : f32 to vector<8x32xf32>
    %10 = arith.maximumf %6, %9 : vector<8x32xf32>
    %11 = arith.truncf %10 : vector<8x32xf32> to vector<8x32xbf16>
    %cst_10 = arith.constant dense<0.000000e+00> : vector<8x32xf32>
    %12 = tpu.matmul %11, %7, %cst_10 {dimension_numbers = #tpu.dot_dimension_numbers<[1], [0], [0], [1], [0, 0, 1, 1], [], []>} : vector<8x32xbf16>, vector<32x32xbf16>, vector<8x32xf32> -> vector<8x32xf32>
    %13 = vector.broadcast %8 : vector<1x32xf32> to vector<8x32xf32>
    %14 = arith.addf %12, %13 : vector<8x32xf32>
    %c0_11 = arith.constant 0 : index
    %c0_12 = arith.constant 0 : index
    %15 = vector.load %arg6[%c0_11, %c0_12] : memref<32x32xbf16, #tpu.memory_space<vmem>>, vector<32x32xbf16>
    %c0_13 = arith.constant 0 : index
    %c0_14 = arith.constant 0 : index
    %16 = vector.load %arg7[%c0_13, %c0_14] : memref<1x32xf32, #tpu.memory_space<vmem>>, vector<1x32xf32>
    %cst_15 = arith.constant 0.000000e+00 : f32
    %17 = vector.broadcast %cst_15 : f32 to vector<8x32xf32>
    %18 = arith.maximumf %14, %17 : vector<8x32xf32>
    %19 = arith.truncf %18 : vector<8x32xf32> to vector<8x32xbf16>
    %cst_16 = arith.constant dense<0.000000e+00> : vector<8x32xf32>
    %20 = tpu.matmul %19, %15, %cst_16 {dimension_numbers = #tpu.dot_dimension_numbers<[1], [0], [0], [1], [0, 0, 1, 1], [], []>} : vector<8x32xbf16>, vector<32x32xbf16>, vector<8x32xf32> -> vector<8x32xf32>
    %21 = vector.broadcast %16 : vector<1x32xf32> to vector<8x32xf32>
    %22 = arith.addf %20, %21 : vector<8x32xf32>
    %c0_17 = arith.constant 0 : index
    %c0_18 = arith.constant 0 : index
    %23 = vector.load %arg8[%c0_17, %c0_18] : memref<32x128xbf16, #tpu.memory_space<vmem>>, vector<32x128xbf16>
    %c0_19 = arith.constant 0 : index
    %c0_20 = arith.constant 0 : index
    %24 = vector.load %arg9[%c0_19, %c0_20] : memref<1x128xf32, #tpu.memory_space<vmem>>, vector<1x128xf32>
    %25 = arith.truncf %22 : vector<8x32xf32> to vector<8x32xbf16>
    %cst_21 = arith.constant dense<0.000000e+00> : vector<8x128xf32>
    %26 = tpu.matmul %25, %23, %cst_21 {dimension_numbers = #tpu.dot_dimension_numbers<[1], [0], [0], [1], [0, 0, 1, 1], [], []>} : vector<8x32xbf16>, vector<32x128xbf16>, vector<8x128xf32> -> vector<8x128xf32>
    %27 = vector.broadcast %24 : vector<1x128xf32> to vector<8x128xf32>
    %28 = arith.addf %26, %27 : vector<8x128xf32>
    %c0_22 = arith.constant 0 : index
    %c0_23 = arith.constant 0 : index
    %29 = vector.load %arg10[%c0_22, %c0_23] : memref<8x128xf32, #tpu.memory_space<vmem>>, vector<8x128xf32>
    tpu.vector_store %arg10[%c0_22, %c0_23], %28 {strides = array<i32>} : memref<8x128xf32, #tpu.memory_space<vmem>>, vector<8x128xf32>,
    %cst_24 = arith.constant dense<0xFF800000> : vector<8xf32>
    %30 = vector.multi_reduction <maximumf>, %28, %cst_24 [1] : vector<8x128xf32> to vector<8xf32>
    %31 = vector.shape_cast %30 : vector<8xf32> to vector<8x1xf32>
    %32 = vector.broadcast %31 : vector<8x1xf32> to vector<8x128xf32>
    %33 = arith.subf %28, %32 : vector<8x128xf32>
    %34 = math.exp %33 : vector<8x128xf32>
    %cst_25 = arith.constant dense<0.000000e+00> : vector<8xf32>
    %35 = vector.multi_reduction <add>, %34, %cst_25 [1] : vector<8x128xf32> to vector<8xf32>
    %36 = vector.shape_cast %35 : vector<8xf32> to vector<8x1xf32>
    %37 = tpu.reciprocal %36 {approx = true} : vector<8x1xf32> -> vector<8x1xf32>
    %38 = vector.broadcast %37 : vector<8x1xf32> to vector<8x128xf32>
    %39 = arith.mulf %34, %38 : vector<8x128xf32>
    %c0_26 = arith.constant 0 : index
    %c0_27 = arith.constant 0 : index
    %40 = vector.load %arg11[%c0_26, %c0_27] : memref<8x128xf32, #tpu.memory_space<vmem>>, vector<8x128xf32>
    tpu.vector_store %arg11[%c0_26, %c0_27], %39 {strides = array<i32>} : memref<8x128xf32, #tpu.memory_space<vmem>>, vector<8x128xf32>,
    return
  }
  func.func @transform_0(%arg0: i32) -> (i32, i32) {
    %c0_i32 = arith.constant 0 : i32
    %c0_i32_0 = arith.constant 0 : i32
    return %arg0, %c0_i32 : i32, i32
  }
  func.func @transform_1(%arg0: i32) -> (i32, i32) {
    %c0_i32 = arith.constant 0 : i32
    %c0_i32_0 = arith.constant 0 : i32
    %c0_i32_1 = arith.constant 0 : i32
    return %c0_i32, %c0_i32_0 : i32, i32
  }
  func.func @transform_2(%arg0: i32) -> (i32, i32) {
    %c0_i32 = arith.constant 0 : i32
    %c0_i32_0 = arith.constant 0 : i32
    %c0_i32_1 = arith.constant 0 : i32
    return %c0_i32, %c0_i32_0 : i32, i32
  }
  func.func @transform_3(%arg0: i32) -> (i32, i32) {
    %c0_i32 = arith.constant 0 : i32
    %c0_i32_0 = arith.constant 0 : i32
    %c0_i32_1 = arith.constant 0 : i32
    return %c0_i32, %c0_i32_0 : i32, i32
  }
  func.func @transform_4(%arg0: i32) -> (i32, i32) {
    %c0_i32 = arith.constant 0 : i32
    %c0_i32_0 = arith.constant 0 : i32
    %c0_i32_1 = arith.constant 0 : i32
    return %c0_i32, %c0_i32_0 : i32, i32
  }
  func.func @transform_5(%arg0: i32) -> (i32, i32) {
    %c0_i32 = arith.constant 0 : i32
    %c0_i32_0 = arith.constant 0 : i32
    %c0_i32_1 = arith.constant 0 : i32
    return %c0_i32, %c0_i32_0 : i32, i32
  }
  func.func @transform_6(%arg0: i32) -> (i32, i32) {
    %c0_i32 = arith.constant 0 : i32
    %c0_i32_0 = arith.constant 0 : i32
    %c0_i32_1 = arith.constant 0 : i32
    return %c0_i32, %c0_i32_0 : i32, i32
  }
  func.func @transform_7(%arg0: i32) -> (i32, i32) {
    %c0_i32 = arith.constant 0 : i32
    %c0_i32_0 = arith.constant 0 : i32
    %c0_i32_1 = arith.constant 0 : i32
    return %c0_i32, %c0_i32_0 : i32, i32
  }
  func.func @transform_8(%arg0: i32) -> (i32, i32) {
    %c0_i32 = arith.constant 0 : i32
    %c0_i32_0 = arith.constant 0 : i32
    %c0_i32_1 = arith.constant 0 : i32
    return %c0_i32, %c0_i32_0 : i32, i32
  }
  func.func @transform_9(%arg0: i32) -> (i32, i32) {
    %c0_i32 = arith.constant 0 : i32
    %c0_i32_0 = arith.constant 0 : i32
    return %arg0, %c0_i32 : i32, i32
  }
  func.func @transform_10(%arg0: i32) -> (i32, i32) {
    %c0_i32 = arith.constant 0 : i32
    %c0_i32_0 = arith.constant 0 : i32
    return %arg0, %c0_i32 : i32, i32
  }
}

</mosaic_0001>

<bundles_post_ra>
// kernel: tpu_custom_call.1
= control target key start
LH: loop header
LB: loop body
LE: loop exit
PB: predicated region body
PF: predicated region fallthrough
CT: control target
= control target key end

     0   :  { %16 = vsyncpa [#allocation3], 0  ;;  %s651_s0 = inlined_call_operand.hbm [shape: f32[8,32], index: 0, kind: input, shape index: {}]   ;;  %s652_s1 = inlined_call_operand.hbm [shape: bf16[32,32], index: 1, kind: input, shape index: {}]   ;;  %s653_s2 = inlined_call_operand.vmem [shape: f32[1,32], index: 2, kind: input, shape index: {}]   ;;  %s654_s3 = inlined_call_operand.hbm [shape: bf16[32,32], index: 3, kind: input, shape index: {}]   ;;  %s655_s4 = inlined_call_operand.vmem [shape: f32[1,32], index: 4, kind: input, shape index: {}]   ;;  %s656_s5 = inlined_call_operand.hbm [shape: bf16[32,32], index: 5, kind: input, shape index: {}]   ;;  %s657_s6 = inlined_call_operand.vmem [shape: f32[1,32], index: 6, kind: input, shape index: {}]   ;;  %s658_s7 = inlined_call_operand.hbm [shape: bf16[32,128], index: 7, kind: input, shape index: {}]   ;;  %s659_s8 = inlined_call_operand.vmem [shape: f32[1,128], index: 8, kind: input, shape index: {}]   ;;  %s660_s9 = inlined_call_operand.hbm [shape: f32[8,128], index: 9, kind: output, shape index: {0}]   ;;  %s661_s10 = inlined_call_operand.hbm [shape: f32[8,128], index: 10, kind: output, shape index: {1}]  }
   0x1   :  { %17 = vsyncpa [#allocation6], 0 }
   0x2   :  { %18 = vsyncpa [#allocation9], 0 }
   0x3   :  { %19 = vsyncpa [#allocation4], 0  ;;  %s36_s15 = sshll.u32 %s652_s1, 4  ;;  %s37_s15 = int_to_ptr.hbm [resolvable:$true] %s36_s15 }
   0x4   :  { %20 = vsyncpa [#allocation13], 0  ;;  %s550_s16 = smov [#allocation5]   ;;  %s66_s20 = sshll.u32 %s656_s5, 4  ;;  %s67_s20 = int_to_ptr.hbm [resolvable:$true] %s66_s20 }
   0x5   :  { %s38_s17 = sshll.u32 %s550_s16, 4  ;;  %s551_s21 = smov 64   ;;  %s39_s17 = int_to_ptr.vmem [resolvable:$true] %s38_s17 }
   0x6   :  { %s552_s22 = smov 4   ;;  %s553_s23 = smov [#allocation8]  }
   0x7   :  { %44 = dma.hbm_to_vmem [thread:$0]  %s37_s15, 256, %s39_s17, [#allocation6], %s551_s21, %s551_s21, %s552_s22  }
   0x8   :  { %s68_s24 = sshll.u32 %s553_s23, 4  ;;  %s26_s27 = sshll.u32 %s651_s0, 4  ;;  %s69_s24 = int_to_ptr.vmem [resolvable:$true] %s68_s24  ;;  %s27_s27 = int_to_ptr.hbm [resolvable:$true] %s26_s27 }
   0x9   :  { %74 = dma.hbm_to_vmem [thread:$0]  %s67_s20, 256, %s69_s24, [#allocation9], %s551_s21, %s551_s21, %s552_s22  }
   0xa   :  { %s51_s29 = sshll.u32 %s654_s3, 4  ;;  %s554_s30 = smov [#allocation2]   ;;  %s52_s29 = int_to_ptr.hbm [resolvable:$true] %s51_s29 }
   0xb   :  { %s28_s11 = sshll.u32 %s554_s30, 4  ;;  %s555_s5 = smov [#allocation7]   ;;  %s29_s11 = int_to_ptr.vmem [resolvable:$true] %s28_s11 }
   0xc   :  { %31 = dma.hbm_to_vmem [thread:$0]  %s27_s27, 128, %s29_s11, [#allocation3]  }
   0xd   :  { %s53_s12 = sshll.u32 %s555_s5, 4  ;;  %s81_s15 = sshll.u32 %s658_s7, 4  ;;  %s54_s12 = int_to_ptr.vmem [resolvable:$true] %s53_s12  ;;  %s82_s15 = int_to_ptr.hbm [resolvable:$true] %s81_s15 }
   0xe   :  { %59 = dma.hbm_to_vmem [thread:$0]  %s52_s29, 256, %s54_s12, [#allocation6], %s551_s21, %s551_s21, %s552_s22  }
   0xf   :  { %s556_s0 = smov [#allocation10]  }
  0x10   :  { %s83_s16 = sshll.u32 %s556_s0, 4  ;;  %s84_s16 = int_to_ptr.vmem [resolvable:$true] %s83_s16 }
  0x11   :  { %89 = dma.hbm_to_vmem [thread:$0]  %s82_s15, 256, %s84_s16, [#allocation9], %s551_s21, %s551_s21, %s552_s22  }
  0x12   :  { %540 = dma.done.wait [#allocation3], 128  }
  0x13   :  { %541 = vsyncadd [#allocation3], 4294967168 }
  0x14   :  { %542 = dma.done.wait [#allocation6], 512  }
  0x15   :  { %543 = vsyncadd [#allocation6], 4294966784 }
  0x16   :  { %544 = dma.done.wait [#allocation9], 512  }
  0x17   :  { %545 = vsyncadd [#allocation9], 4294966784  ;;  %v348_v0 = vld [vmem:[#allocation5 + $0x8] sm:$0xff]  ;;  %v347_v1 = vld [vmem:[#allocation5] sm:$0xff]  ;;  %vm135_vm0 = vcmask 261120   ;;  %s557_s23 = smov [#allocation11]  }
  0x18   :  { %145 = vmatpush.bf16.msra.mxu0 %v348_v0  ;;  %v113_v2 = vld [vmem:[#allocation2] sm:$0xff]  ;;  %v349_v5 = vld [vmem:[#allocation7] sm:$0xff]  ;;  %v352_v12 = vld [vmem:[#allocation8 + $0x8] sm:$0xff]  ;;  %s281_s24 = sshll.u32 %s557_s23, 4  ;;  %s294_s1 = sshll.u32 %s661_s10, 4  ;;  %s282_s24 = int_to_ptr.vmem [resolvable:$true] %s281_s24  ;;  %s295_s1 = int_to_ptr.hbm [resolvable:$true] %s294_s1 }
  0x19   :  { %v119_v3 = vpack.c.bf16 %v113_v2, %v113_v2  ;;  %v350_v4 = vld [vmem:[#allocation7 + $0x8] sm:$0xff]  ;;  %221 = vmatpush.bf16.msra.mxu2 %v352_v12  ;;  %v351_v13 = vld [vmem:[#allocation8] sm:$0xff]  ;;  %v353_v21 = vld [vmem:[#allocation10] sm:$0xff] }
  0x1a   :  { %183 = vmatpush.bf16.msra.mxu1 %v350_v4  ;;  %v364_v6 = vld [vmem:[%s653_s2] ss:$0 sm:$0xff] }
  0x1b   :  { %v354_v14 = vld [vmem:[#allocation10 + $0x8] sm:$0xff] }
  0x1c   :  { %146 = vmatpush.bf16.msra.mxu0 %v347_v1  ;;  %258 = vmatpush.bf16.msra.mxu3 %v354_v14  ;;  %v365_v15 = vld [vmem:[%s655_s4] ss:$0 sm:$0xff] }
  0x1d   :  { %222 = vmatpush.bf16.msra.mxu2 %v351_v13  ;;  %v366_v22 = vld [vmem:[%s657_s6] ss:$0 sm:$0xff]  ;;  %s283_s6 = sshll.u32 %s660_s9, 4  ;;  %s284_s6 = int_to_ptr.hbm [resolvable:$true] %s283_s6 }
  0x1e   :  { %184 = vmatpush.bf16.msra.mxu1 %v349_v5  ;;  %v367_v27 = vld [vmem:[%s659_s8] ss:$0 sm:$0xff]  ;;  %s558_s8 = smov [#allocation12]  }
  0x1f   :  { %319 = vmatmul.msk.bf16.vlgmr.msra.gmra.mxu0 %vm135_vm0, %v119_v3  ;;  %s292_s25 = sshll.u32 %s558_s8, 4  ;;  %s293_s25 = int_to_ptr.vmem [resolvable:$true] %s292_s25 }
  0x20   :  { %259 = vmatpush.bf16.msra.mxu3 %v353_v21 }
  0x9c   :  { %v148_v7 = vpop.f32.mrf.mxu0 }
  0x9d   :  { %v149_v8 = vadd.f32 %v364_v6, %v148_v7 }
  0x9f   :  { %v157_v9 = vmax.f32 %v149_v8, 0.0 }
  0xa1   :  { %v158_v10 = vpack.c.bf16 %v157_v9, %v157_v9 }
  0xa3   :  { %328 = vmatmul.msk.bf16.vlgmr.msra.gmra.mxu1 %vm135_vm0, %v158_v10 }
  0xa4   :  { %v150_v11 = vpop.f32.mrf.mxu0 }
 0x120   :  { %v186_v16 = vpop.f32.mrf.mxu1 }
 0x121   :  { %v187_v17 = vadd.f32 %v365_v15, %v186_v16 }
 0x123   :  { %v195_v18 = vmax.f32 %v187_v17, 0.0 }
 0x125   :  { %v196_v19 = vpack.c.bf16 %v195_v18, %v195_v18 }
 0x127   :  { %337 = vmatmul.msk.bf16.vlgmr.msra.gmra.mxu2 %vm135_vm0, %v196_v19 }
 0x128   :  { %v188_v20 = vpop.f32.mrf.mxu1 }
 0x1aa   :  { %v224_v23 = vpop.f32.mrf.mxu2 }
 0x1ab   :  { %v225_v24 = vadd.f32 %v366_v22, %v224_v23 }
 0x1ad   :  { %v233_v25 = vpack.c.bf16 %v225_v24, %v225_v24 }
 0x1af   :  { %346 = vmatmul.msk.bf16.vlgmr.msra.gmra.mxu3 %vm135_vm0, %v233_v25 }
 0x1b2   :  { %v226_v26 = vpop.f32.mrf.mxu2 }
 0x232   :  { %v261_v28 = vpop.f32.mrf.mxu3 }
 0x233   :  { %v262_v29 = vadd.f32 %v367_v27, %v261_v28 }
 0x235   :  { %265 = vst [vmem:[#allocation11] sm:$0xff] %v262_v29  ;;  %266 = vmax.xlane.f32.xlu0 %v262_v29 }
 0x236   :  { %286 = dma.vmem_to_hbm [thread:$0]  %s282_s24, 128, %s284_s6, [#allocation4]  }
 0x23a   :  { %v263_v30 = vpop.f32.mrf.mxu3 }
 0x2a8   :  { %v267_v31 = vpop.xlane.xlu0 %266 }
 0x2a9   :  { %v268_v32 = vsub.f32 %v262_v29, %v267_v31 }
 0x2ab   :  { %v269_v33 = vmul.f32 1.442695, %v268_v32 }
 0x2ad   :  { %368 = vpow2.f32 %v269_v33 }
 0x2b3   :  { %v369_v34 = vpop.eup %368 }
 0x2b4   :  { %271 = vadd.xlane.f32.xlu0 %v369_v34 }
 0x327   :  { %v272_v35 = vpop.xlane.xlu0 %271 }
 0x328   :  { %370 = vrcp.f32 %v272_v35 }
 0x32e   :  { %v371_v36 = vpop.eup %370 }
 0x32f   :  { %v274_v37 = vmul.f32 %v371_v36, %v369_v34 }
 0x331   :  { %275 = vst [vmem:[#allocation12] sm:$0xff] %v274_v37 }
 0x332   :  { %297 = dma.vmem_to_hbm [thread:$0]  %s293_s25, 128, %s295_s1, [#allocation13]  }
 0x333   :  { %546 = dma.done.wait [#allocation4], 128  }
 0x334   :  { %547 = vsyncadd [#allocation4], 4294967168 }
 0x335   :  { %548 = dma.done.wait [#allocation13], 128  }
 0x336   :  { %549 = vsyncadd [#allocation13], 4294967168 }
 0x337   :  { %306 = vsyncpa [#allocation3], 1 }
 0x338   :  { %307 = vsyncpa [#allocation6], 1 }
 0x339   :  { %308 = vsyncpa [#allocation9], 1 }
 0x33a   :  { %309 = vsyncpa [#allocation4], 1 }
 0x33b   :  { %310 = vsyncpa [#allocation13], 1 }

</bundles_post_ra>
